<compile_context>
chip_gen: v6e
topology: v6e:2x2x1
jax: 0.10.0
libtpu: 0.0.40
codegen_flags: <defaults>
</compile_context>

<pallas_src>
import typing as t

import jax
import jax.numpy as jnp
from jax import lax
from jax.experimental import pallas as pl
from jax.experimental.pallas import tpu as pltpu


def _round_up(x: int, m: int) -> int:
    return (x + m - 1) // m * m


def _glove_onehot_matmul_kernel(idx_ref, wgt_ref, vec_ref, out_ref):
    """Grid = (num_row_tiles,). One grid step owns one (TN, D) output tile.

    vec_ref holds the full (V, D) table resident in VMEM (constant block index).
    Instead of a scalar-indexed per-row gather, the tile builds a sparse one-hot
    weight matrix W (TN, V) from its sub-word indices -- validity mask and 1/count
    already folded into the weights on the host -- and computes the whole tile with
    a single MXU matmul:  out = W @ table.  Duplicate sub-word indices simply add
    their weights, which matches the mean-of-parts semantics exactly."""
    tn = out_ref.shape[0]
    vocab = vec_ref.shape[0]
    idx = idx_ref[...]                       # (TN, K) int32 sub-word indices
    wgt = wgt_ref[...]                       # (TN, K) f32   per-sub-word weights
    col = lax.broadcasted_iota(jnp.int32, (tn, vocab), 1)
    n_sub = idx.shape[1]
    # K is small & static -> unrolled VPU compares accumulating the (TN, V) weights.
    w = jnp.where(col == idx[:, 0:1], wgt[:, 0:1], 0.0)
    for k in range(1, n_sub):
        w = w + jnp.where(col == idx[:, k:k + 1], wgt[:, k:k + 1], 0.0)
    out_ref[...] = jnp.dot(
        w, vec_ref[...], preferred_element_type=jnp.float32).astype(out_ref.dtype)


def _vmem_budget_bytes(table_bytes: int, tn: int, k: int, d: int, vocab: int) -> int:
    """Generation-aware scoped-VMEM request."""
    # table is double-buffered by the pipeline (constant block index => fetched once,
    # but two buffers are still allocated); idx/wgt/out tiles are double-buffered; the
    # in-kernel (TN, V) one-hot weight temporary lives in VMEM too.
    needed = 2 * table_bytes
    needed += 2 * tn * d * 4                         # out tile (x2 buffers)
    needed += 2 * 2 * tn * max(k, 128) * 4           # idx + wgt tiles, lane-padded
    needed += tn * vocab * 4                         # one-hot weight temporary
    needed += 4 << 20                                # compiler scratch headroom
    try:
        phys = int(pltpu.get_tpu_info().vmem_capacity_bytes)
    except Exception:  # interpret mode / no TPU info available
        phys = 64 * 1024 * 1024
    cap = max(phys - 8 * 1024 * 1024, 32 * 1024 * 1024)   # leave headroom (v7x: ~56 MiB)
    return int(min(max(needed, 32 * 1024 * 1024), cap))


def glove_encode(vectors: jax.Array, idx: jax.Array, cnt: jax.Array,
                 *, tile_rows: int = 512) -> jax.Array:
    """vectors: (V, D) f32 embedding table (kept resident in VMEM)
       idx:     (N, K) int32 sub-word indices (padded with 0)
       cnt:     (N,)   int32 number of valid sub-word indices per word
       returns  (N, D) f32: mean of the gathered rows per word."""
    N, K = idx.shape
    V, D = vectors.shape

    # Row tile: sublane-dense (multiple of 8), large to amortize per-step overhead.
    tn = min(_round_up(tile_rows, 8), _round_up(N, 8))
    n_pad = _round_up(N, tn)
    idx = idx.astype(jnp.int32)
    cnt = cnt.astype(jnp.int32)
    if n_pad != N:
        idx = jnp.pad(idx, ((0, n_pad - N), (0, 0)))
        cnt = jnp.pad(cnt, (0, n_pad - N), constant_values=1)
    # Fold the validity mask and 1/cnt into per-sub-word weights (host side, cheap):
    # padded rows get weight [1, 0, ...] -> compute table row 0, sliced off below.
    wgt = (jnp.arange(K, dtype=jnp.int32)[None, :] < cnt[:, None]).astype(jnp.float32)
    wgt = wgt / cnt[:, None].astype(jnp.float32)
    num_tiles = n_pad // tn

    itemsize = jnp.dtype(vectors.dtype).itemsize
    vmem_limit = _vmem_budget_bytes(V * D * itemsize, tn, K, D, V)
    # TODO(synk): for vocabularies whose table cannot stay resident in VMEM, switch
    # the table to memory_space=pl.ANY + a manual double-buffered DMA row gather.

    out = pl.pallas_call(
        _glove_onehot_matmul_kernel,
        out_shape=jax.ShapeDtypeStruct((n_pad, D), vectors.dtype),
        grid_spec=pltpu.PrefetchScalarGridSpec(
            num_scalar_prefetch=0,
            grid=(num_tiles,),
            in_specs=[
                pl.BlockSpec((tn, K), lambda i: (i, 0)),      # sub-word indices
                pl.BlockSpec((tn, K), lambda i: (i, 0)),      # folded 1/cnt weights
                # whole table resident in VMEM; constant block index => fetched once
                pl.BlockSpec((V, D), lambda i: (0, 0)),
            ],
            out_specs=pl.BlockSpec((tn, D), lambda i: (i, 0)),
        ),
        compiler_params=pltpu.CompilerParams(
            dimension_semantics=("parallel",),
            vmem_limit_bytes=vmem_limit),
    )(idx, wgt, vectors)
    return out[:N]


class GloVeJax:
    """JAX/Pallas equivalent of the GloVe module's forward path.

    Parameters (the (V, D) embedding table) are initialized deterministically
    in-script instead of being parsed from a GloVe text / pickle file."""
    # TODO(synk): file / s3 loading and pickle caching from __init__ have no tensor
    # equivalent; vocabulary is synthesized in-script.

    def __init__(self, size: int, vocab_words: t.Sequence[str], key):
        self._size = size
        self._words = [w.lower() for w in vocab_words]
        self._word_to_idx = {w: i for i, w in enumerate(self._words)}
        self._vectors = jax.random.normal(
            key, (len(self._words), size), dtype=jnp.float32)

    def _encode_single_indices(self, word: str) -> t.List[int]:
        word = word.lower()
        if word in self._word_to_idx:
            return [self._word_to_idx[word]]
        # encode_split semantics: split on ' ' then '-', average the parts
        parts = [word]
        for splitter in (' ', '-'):
            out = []
            for w in parts:
                out.extend(w.split(splitter))
            parts = out
        return [self._word_to_idx[w] for w in parts]

    def word_groups(self, inp: t.Union[t.Sequence[str], str]):
        words = [inp] if isinstance(inp, str) else list(inp)
        return [self._encode_single_indices(w) for w in words]

    def forward(self, inp: t.Union[t.Sequence[str], str]) -> jax.Array:
        single = isinstance(inp, str)
        groups = self.word_groups(inp)
        K = max(len(g) for g in groups)
        idx = jnp.array(
            [[g[j] if j < len(g) else 0 for j in range(K)] for g in groups],
            dtype=jnp.int32)
        cnt = jnp.array([len(g) for g in groups], dtype=jnp.int32)
        out = glove_encode(self._vectors, idx, cnt)
        return out[0] if single else out

    __call__ = forward


if __name__ == "__main__":
    key = jax.random.PRNGKey(0)

    V = 256   # vocab size
    D = 128   # embedding size (GloVe "size")
    vocab = [f"w{i:03d}" for i in range(V)]
    glove = GloVeJax(size=D, vocab_words=vocab, key=key)

    # mix of in-vocab words and OOV compounds (exercise the split + mean path)
    words = ["w000", "w017", "w003-w004", "w100 w101", "W250",
             "w001-w002 w003", "w042", "w255"]

    out = jax.block_until_ready(glove(words))
    assert out.shape == (len(words), D) and out.dtype == jnp.float32

    # pure-JAX reference for correctness
    groups = glove.word_groups(words)
    ref = jnp.stack(
        [jnp.mean(glove._vectors[jnp.array(g, dtype=jnp.int32)], axis=0)
         for g in groups])
    assert jnp.allclose(out, ref, atol=1e-4, rtol=1e-4), "mismatch vs reference"

    # single-word (str) path returns a (D,) vector
    single = jax.block_until_ready(glove("w123"))
    assert single.shape == (D,)
    assert jnp.allclose(single, glove._vectors[123], atol=1e-4, rtol=1e-4)

    # multi-tile + row-padding path (N not a multiple of the tile, tile_rows=8)
    ki, kc = jax.random.split(jax.random.PRNGKey(1))
    N2, K2 = 20, 3
    idx2 = jax.random.randint(ki, (N2, K2), 0, V, dtype=jnp.int32)
    cnt2 = jax.random.randint(kc, (N2,), 1, K2 + 1, dtype=jnp.int32)
    out2 = jax.block_until_ready(glove_encode(glove._vectors, idx2, cnt2, tile_rows=8))
    mask2 = (jnp.arange(K2)[None, :] < cnt2[:, None]).astype(jnp.float32)
    ref2 = (glove._vectors[idx2] * mask2[..., None]).sum(1) / cnt2[:, None].astype(jnp.float32)
    assert out2.shape == (N2, D)
    assert jnp.allclose(out2, ref2, atol=1e-4, rtol=1e-4), "mismatch vs reference (tiled)"

    print("KERNEL_OK")
</pallas_src>

<mosaic_0001>
module attributes {stable_mosaic.version = 11 : i64} {
  func.func @_glove_onehot_matmul_kernel(%arg0: i32, %arg1: memref<8x3xi32, #tpu.memory_space<vmem>>, %arg2: memref<8x3xf32, #tpu.memory_space<vmem>>, %arg3: memref<256x128xf32, #tpu.memory_space<vmem>>, %arg4: memref<8x128xf32, #tpu.memory_space<vmem>>) attributes {dimension_semantics = [#tpu.dimension_semantics<parallel>], iteration_bounds = array<i64: 1>, scalar_prefetch = 0 : i64, scratch_operands = 0 : i64, tpu.core_type = #tpu.core_type<tc>, window_params = [{transform_indices = @transform_0, window_bounds = array<i64: 8, 3>}, {transform_indices = @transform_1, window_bounds = array<i64: 8, 3>}, {pipeline_mode = #tpu.pipeline_mode<synchronous>, transform_indices = @transform_2, window_bounds = array<i64: 256, 128>}, {transform_indices = @transform_3, window_bounds = array<i64: 8, 128>}]} {
    %c0 = arith.constant 0 : index
    %c0_0 = arith.constant 0 : index
    %0 = vector.load %arg1[%c0, %c0_0] : memref<8x3xi32, #tpu.memory_space<vmem>>, vector<8x3xi32>
    %c0_1 = arith.constant 0 : index
    %c0_2 = arith.constant 0 : index
    %1 = vector.load %arg2[%c0_1, %c0_2] : memref<8x3xf32, #tpu.memory_space<vmem>>, vector<8x3xf32>
    %2 = tpu.iota {dimensions = array<i32: 1>} : vector<8x256xi32>
    %3 = vector.extract_strided_slice %0 {offsets = [0, 0], sizes = [8, 1], strides = [1, 1]} : vector<8x3xi32> to vector<8x1xi32>
    %4 = vector.broadcast %3 : vector<8x1xi32> to vector<8x256xi32>
    %5 = arith.cmpi eq, %2, %4 : vector<8x256xi32>
    %6 = vector.extract_strided_slice %1 {offsets = [0, 0], sizes = [8, 1], strides = [1, 1]} : vector<8x3xf32> to vector<8x1xf32>
    %cst = arith.constant 0.000000e+00 : f32
    %7 = vector.shape_cast %6 : vector<8x1xf32> to vector<8x1xf32>
    %8 = vector.broadcast %7 : vector<8x1xf32> to vector<8x256xf32>
    %9 = vector.broadcast %cst : f32 to vector<8x256xf32>
    %10 = arith.select %5, %8, %9 : vector<8x256xi1>, vector<8x256xf32>
    %11 = vector.extract_strided_slice %0 {offsets = [0, 1], sizes = [8, 1], strides = [1, 1]} : vector<8x3xi32> to vector<8x1xi32>
    %12 = vector.broadcast %11 : vector<8x1xi32> to vector<8x256xi32>
    %13 = arith.cmpi eq, %2, %12 : vector<8x256xi32>
    %14 = vector.extract_strided_slice %1 {offsets = [0, 1], sizes = [8, 1], strides = [1, 1]} : vector<8x3xf32> to vector<8x1xf32>
    %cst_3 = arith.constant 0.000000e+00 : f32
    %15 = vector.shape_cast %14 : vector<8x1xf32> to vector<8x1xf32>
    %16 = vector.broadcast %15 : vector<8x1xf32> to vector<8x256xf32>
    %17 = vector.broadcast %cst_3 : f32 to vector<8x256xf32>
    %18 = arith.select %13, %16, %17 : vector<8x256xi1>, vector<8x256xf32>
    %19 = arith.addf %10, %18 : vector<8x256xf32>
    %20 = vector.extract_strided_slice %0 {offsets = [0, 2], sizes = [8, 1], strides = [1, 1]} : vector<8x3xi32> to vector<8x1xi32>
    %21 = vector.broadcast %20 : vector<8x1xi32> to vector<8x256xi32>
    %22 = arith.cmpi eq, %2, %21 : vector<8x256xi32>
    %23 = vector.extract_strided_slice %1 {offsets = [0, 2], sizes = [8, 1], strides = [1, 1]} : vector<8x3xf32> to vector<8x1xf32>
    %cst_4 = arith.constant 0.000000e+00 : f32
    %24 = vector.shape_cast %23 : vector<8x1xf32> to vector<8x1xf32>
    %25 = vector.broadcast %24 : vector<8x1xf32> to vector<8x256xf32>
    %26 = vector.broadcast %cst_4 : f32 to vector<8x256xf32>
    %27 = arith.select %22, %25, %26 : vector<8x256xi1>, vector<8x256xf32>
    %28 = arith.addf %19, %27 : vector<8x256xf32>
    %c0_5 = arith.constant 0 : index
    %c0_6 = arith.constant 0 : index
    %29 = vector.load %arg3[%c0_5, %c0_6] : memref<256x128xf32, #tpu.memory_space<vmem>>, vector<256x128xf32>
    %cst_7 = arith.constant dense<0.000000e+00> : vector<8x128xf32>
    %30 = tpu.matmul %28, %29, %cst_7 {dimension_numbers = #tpu.dot_dimension_numbers<[1], [0], [0], [1], [0, 0, 1, 1], [], []>} : vector<8x256xf32>, vector<256x128xf32>, vector<8x128xf32> -> vector<8x128xf32>
    %c0_8 = arith.constant 0 : index
    %c0_9 = arith.constant 0 : index
    %31 = vector.load %arg4[%c0_8, %c0_9] : memref<8x128xf32, #tpu.memory_space<vmem>>, vector<8x128xf32>
    tpu.vector_store %arg4[%c0_8, %c0_9], %30 {strides = array<i32>} : memref<8x128xf32, #tpu.memory_space<vmem>>, vector<8x128xf32>,
    return
  }
  func.func @transform_0(%arg0: i32) -> (i32, i32) {
    %c0_i32 = arith.constant 0 : i32
    %c0_i32_0 = arith.constant 0 : i32
    return %arg0, %c0_i32 : i32, i32
  }
  func.func @transform_1(%arg0: i32) -> (i32, i32) {
    %c0_i32 = arith.constant 0 : i32
    %c0_i32_0 = arith.constant 0 : i32
    return %arg0, %c0_i32 : i32, i32
  }
  func.func @transform_2(%arg0: i32) -> (i32, i32) {
    %c0_i32 = arith.constant 0 : i32
    %c0_i32_0 = arith.constant 0 : i32
    %c0_i32_1 = arith.constant 0 : i32
    return %c0_i32, %c0_i32_0 : i32, i32
  }
  func.func @transform_3(%arg0: i32) -> (i32, i32) {
    %c0_i32 = arith.constant 0 : i32
    %c0_i32_0 = arith.constant 0 : i32
    return %arg0, %c0_i32 : i32, i32
  }
}

</mosaic_0001>

<bundles_post_ra>
// kernel: tpu_custom_call.1
= control target key start
LH: loop header
LB: loop body
LE: loop exit
PB: predicated region body
PF: predicated region fallthrough
CT: control target
= control target key end

     0   :  { %8 = vsyncpa [#allocation3], 0  ;;  %s321_s0 = inlined_call_operand.vmem [shape: s32[8,3], index: 0, kind: input, shape index: {}]   ;;  %s322_s1 = inlined_call_operand.vmem [shape: f32[8,3], index: 1, kind: input, shape index: {}]   ;;  %s323_s2 = inlined_call_operand.hbm [shape: f32[256,128], index: 2, kind: input, shape index: {}]   ;;  %s324_s3 = inlined_call_operand.hbm [shape: f32[8,128], index: 3, kind: output, shape index: {}]  }
   0x1   :  { %9 = vsyncpa [#allocation4], 0  ;;  %s282_s12 = smov [#allocation2]  }
   0x2   :  { %s19_s13 = sshll.u32 %s282_s12, 4  ;;  %s20_s13 = int_to_ptr.vmem [resolvable:$true] %s19_s13 }
   0x3   :  { %s246_s14 = scalar_lea.vmem %s20_s13, 4096  ;;  %p251_p1 = scmp.lt.s32.totalorder %s20_s13, %s20_s13 }
   0x4   :  { %p247_p0 = scmp.ne.s32.totalorder %s20_s13, %s246_s14  ;;  %p252_p2 = scmp.lt.s32.totalorder %s246_s14, %s246_s14 }
   0x6   :  { %p253_p3 = por %p252_p2, %p251_p1 }
   0x8   :  { %p254_p4 = pnand %p253_p3, %p247_p0 }
   0xa   :  { %257 = shalt.err (!%p254_p4)
}
   0xb   :  { %s283_s15 = smov 128   ;;  %s284_s16 = smov 8  }
   0xc   :  { %25 = dma.hbm_to_vmem [thread:$0]  %s323_s2, 4096, %s20_s13, [#allocation3], %s283_s15, %s283_s15, %s284_s16  }
   0xd   :  { %278 = dma.done.wait [#allocation3], 4096  }
   0xe   :  { %279 = vsyncadd [#allocation3], 4294963200  ;;  %v285_v0 = vmov 0   ;;  %v30_v1 = vld [vmem:[%s322_s1] sm:$0xff]  ;;  %v103_v3 = vld [vmem:[#allocation2 + $0xf8] sm:$0xff]  ;;  %v286_v7 = vmov 1   ;;  %v31_v37 = vlaneseq }
   0xf   :  { %234 = vset.pattern.permute.xlu1 %v285_v0  ;;  %232 = vset.pattern.permute.xlu0 %v285_v0  ;;  %v29_v2 = vld [vmem:[%s321_s0] sm:$0xff]  ;;  %v87_v4 = vld [vmem:[#allocation2 + $0x78] sm:$0xff]  ;;  %v102_v5 = vld [vmem:[#allocation2 + $0xf0] sm:$0xff]  ;;  %v287_v11 = vmov 2   ;;  %s288_s0 = smov [#allocation5]  }
  0x10   :  { %41 = vperm.xlu1 %234, %v30_v1   ;;  %35 = vperm.xlu0 %232, %v29_v2   ;;  %v86_v6 = vld [vmem:[#allocation2 + $0x70] sm:$0xff]  ;;  %v101_v8 = vld [vmem:[#allocation2 + $0xe8] sm:$0xff]  ;;  %v100_v10 = vld [vmem:[#allocation2 + $0xe0] sm:$0xff]  ;;  %v32_v38 = vand.u32 127, %v31_v37  ;;  %s181_s1 = sshll.u32 %s288_s0, 4  ;;  %s182_s1 = int_to_ptr.vmem [resolvable:$true] %s181_s1 }
  0x11   :  { %190 = vmatprep.subr.mxu0 %v103_v3  ;;  %v85_v9 = vld [vmem:[#allocation2 + $0x68] sm:$0xff]  ;;  %v84_v12 = vld [vmem:[#allocation2 + $0x60] sm:$0xff]  ;;  %v99_v13 = vld [vmem:[#allocation2 + $0xd8] sm:$0xff]  ;;  %s258_s2 = scalar_lea.vmem %s182_s1, 128  ;;  %p263_p6 = scmp.lt.s32.totalorder %s182_s1, %s182_s1 }
  0x12   :  { %191 = vmatpush3.msra.mxu0 %v87_v4  ;;  %v83_v14 = vld [vmem:[#allocation2 + $0x58] sm:$0xff]  ;;  %v98_v15 = vld [vmem:[#allocation2 + $0xd0] sm:$0xff]  ;;  %v97_v17 = vld [vmem:[#allocation2 + $0xc8] sm:$0xff]  ;;  %v33_v41 = vadd.s32 128, %v32_v38  ;;  %p259_p5 = scmp.ne.s32.totalorder %s182_s1, %s258_s2  ;;  %p264_p7 = scmp.lt.s32.totalorder %s258_s2, %s258_s2 }
  0x13   :  { %192 = vmatprep.subr.mxu0 %v102_v5  ;;  %v82_v16 = vld [vmem:[#allocation2 + $0x50] sm:$0xff]  ;;  %v81_v18 = vld [vmem:[#allocation2 + $0x48] sm:$0xff]  ;;  %v96_v19 = vld [vmem:[#allocation2 + $0xc0] sm:$0xff] }
  0x14   :  { %235 = vset.pattern.permute.xlu1 %v286_v7  ;;  %233 = vset.pattern.permute.xlu0 %v286_v7  ;;  %v80_v20 = vld [vmem:[#allocation2 + $0x40] sm:$0xff]  ;;  %v95_v21 = vld [vmem:[#allocation2 + $0xb8] sm:$0xff]  ;;  %v94_v23 = vld [vmem:[#allocation2 + $0xb0] sm:$0xff]  ;;  %p265_p8 = por %p264_p7, %p263_p6 }
  0x15   :  { %52 = vperm.xlu1 %235, %v30_v1   ;;  %47 = vperm.xlu0 %233, %v29_v2   ;;  %v79_v22 = vld [vmem:[#allocation2 + $0x38] sm:$0xff]  ;;  %v78_v24 = vld [vmem:[#allocation2 + $0x30] sm:$0xff]  ;;  %v93_v25 = vld [vmem:[#allocation2 + $0xa8] sm:$0xff] }
  0x16   :  { %193 = vmatpush3.msra.mxu0 %v86_v6  ;;  %v77_v26 = vld [vmem:[#allocation2 + $0x28] sm:$0xff]  ;;  %v92_v27 = vld [vmem:[#allocation2 + $0xa0] sm:$0xff]  ;;  %v91_v29 = vld [vmem:[#allocation2 + $0x98] sm:$0xff]  ;;  %p266_p9 = pnand %p265_p8, %p259_p5 }
  0x17   :  { %194 = vmatprep.subr.mxu0 %v101_v8  ;;  %v76_v28 = vld [vmem:[#allocation2 + $0x20] sm:$0xff]  ;;  %v75_v30 = vld [vmem:[#allocation2 + $0x18] sm:$0xff]  ;;  %v90_v31 = vld [vmem:[#allocation2 + $0x90] sm:$0xff] }
  0x18   :  { %195 = vmatpush3.msra.mxu0 %v85_v9  ;;  %v74_v32 = vld [vmem:[#allocation2 + $0x10] sm:$0xff]  ;;  %v89_v33 = vld [vmem:[#allocation2 + $0x88] sm:$0xff]  ;;  %v88_v35 = vld [vmem:[#allocation2 + $0x80] sm:$0xff] }
  0x19   :  { %236 = vset.pattern.permute.xlu1 %v287_v11  ;;  %237 = vset.pattern.permute.xlu0 %v287_v11  ;;  %v73_v34 = vld [vmem:[#allocation2 + $0x8] sm:$0xff]  ;;  %v72_v36 = vld [vmem:[#allocation2] sm:$0xff] }
  0x1a   :  { %60 = vperm.xlu1 %236, %v29_v2   ;;  %65 = vperm.xlu0 %237, %v30_v1  }
  0x1b   :  { %196 = vmatprep.subr.mxu0 %v100_v10 }
  0x1c   :  { %197 = vmatpush3.msra.mxu0 %v84_v12 }
  0x1d   :  { %198 = vmatprep.subr.mxu0 %v99_v13 }
  0x1e   :  { %199 = vmatpush3.msra.mxu0 %v83_v14 }
  0x1f   :  { %200 = vmatprep.subr.mxu0 %v98_v15 }
  0x20   :  { %201 = vmatpush3.msra.mxu0 %v82_v16 }
  0x21   :  { %202 = vmatprep.subr.mxu0 %v97_v17 }
  0x22   :  { %203 = vmatpush3.msra.mxu0 %v81_v18 }
  0x23   :  { %204 = vmatprep.subr.mxu0 %v96_v19 }
  0x24   :  { %205 = vmatpush3.msra.mxu0 %v80_v20 }
  0x25   :  { %206 = vmatprep.subr.mxu0 %v95_v21 }
  0x26   :  { %207 = vmatpush3.msra.mxu0 %v79_v22 }
  0x27   :  { %208 = vmatprep.subr.mxu0 %v94_v23 }
  0x28   :  { %209 = vmatpush3.msra.mxu0 %v78_v24 }
  0x29   :  { %210 = vmatprep.subr.mxu0 %v93_v25 }
  0x2a   :  { %211 = vmatpush3.msra.mxu0 %v77_v26 }
  0x2b   :  { %212 = vmatprep.subr.mxu0 %v92_v27 }
  0x2c   :  { %213 = vmatpush3.msra.mxu0 %v76_v28 }
  0x2d   :  { %214 = vmatprep.subr.mxu0 %v91_v29 }
  0x2e   :  { %215 = vmatpush3.msra.mxu0 %v75_v30 }
  0x2f   :  { %216 = vmatprep.subr.mxu0 %v90_v31 }
  0x30   :  { %217 = vmatpush3.msra.mxu0 %v74_v32 }
  0x31   :  { %218 = vmatprep.subr.mxu0 %v89_v33 }
  0x32   :  { %219 = vmatpush3.msra.mxu0 %v73_v34 }
  0x33   :  { %220 = vmatprep.subr.mxu0 %v88_v35 }
  0x34   :  { %221 = vmatpush3.msra.mxu0 %v72_v36 }
  0x8b   :  { %v42_v39 = vpop.permute.xlu1 %41  ;;  %v36_v40 = vpop.permute.xlu0 %35 }
  0x8c   :  { %vm37_vm2 = vcmp.eq.s32.totalorder %v32_v38, %v36_v40  ;;  %vm38_vm3 = vcmp.eq.s32.totalorder %v33_v41, %v36_v40 }
  0x8d   :  { %v44_v46 = vsel %vm37_vm2, %v42_v39, 0.0  ;;  %v45_v47 = vsel %vm38_vm3, %v42_v39, 0.0 }
  0x90   :  { %v53_v42 = vpop.permute.xlu1 %52  ;;  %v48_v43 = vpop.permute.xlu0 %47 }
  0x91   :  { %vm49_vm0 = vcmp.eq.s32.totalorder %v32_v38, %v48_v43  ;;  %vm50_vm1 = vcmp.eq.s32.totalorder %v33_v41, %v48_v43 }
  0x92   :  { %v55_v44 = vsel %vm49_vm0, %v53_v42, 0.0  ;;  %v56_v45 = vsel %vm50_vm1, %v53_v42, 0.0 }
  0x93   :  { %v57_v50 = vadd.f32 %v55_v44, %v44_v46  ;;  %v58_v51 = vadd.f32 %v56_v45, %v45_v47 }
  0x95   :  { %v61_v48 = vpop.permute.xlu1 %60  ;;  %v66_v49 = vpop.permute.xlu0 %65 }
  0x96   :  { %vm62_vm4 = vcmp.eq.s32.totalorder %v32_v38, %v61_v48  ;;  %vm63_vm5 = vcmp.eq.s32.totalorder %v33_v41, %v61_v48 }
  0x97   :  { %v68_v52 = vsel %vm62_vm4, %v66_v49, 0.0  ;;  %v69_v53 = vsel %vm63_vm5, %v66_v49, 0.0 }
  0x98   :  { %v70_v54 = vadd.f32 %v68_v52, %v57_v50  ;;  %v71_v55 = vadd.f32 %v69_v53, %v58_v51 }
  0x9a   :  { %168 = vmatprep.mubr.f32.mxu0 %v71_v55 }
  0x9b   :  { %169 = vmatmul.mubr.f32.vlgmr.msra.gmra.mxu0 %v70_v54 }
 0x15b   :  { %v222_v56 = vpop.f32.mrf.mxu0 }
 0x15d   :  { %v223_v57 = vpop.f32.mrf.mxu0 }
 0x15e   :  { %v224_v58 = vadd.f32 %v223_v57, %v222_v56 }
 0x160   :  { %174 = vst [vmem:[#allocation5] sm:$0xff] %v224_v58 }
 0x161   :  { %269 = shalt.err (!%p266_p9)
}
 0x162   :  { %184 = dma.vmem_to_hbm [thread:$0]  %s182_s1, 128, %s324_s3, [#allocation4]  }
 0x163   :  { %280 = dma.done.wait [#allocation4], 128  }
 0x164   :  { %281 = vsyncadd [#allocation4], 4294967168 }
 0x165   :  { %188 = vsyncpa [#allocation3], 1 }
 0x166   :  { %189 = vsyncpa [#allocation4], 1 }

</bundles_post_ra>
